<compile_context>
chip_gen: v5e
topology: v5e:2x2
jax: 0.10.0
libtpu: 0.0.40
codegen_flags: <defaults>
</compile_context>

<pallas_src>
import functools

import jax
import jax.numpy as jnp
from jax import lax
from jax.experimental import pallas as pl
from jax.experimental.pallas import tpu as pltpu


def _reion_kernel(x_ref, w1_ref, b1_ref, w2_ref, b2_ref, o_ref, taps_ref, *, wp):
    """Single-step body (channels-first, batch folded into the lane axis).

    x_ref:    (Cin,  LANES)   zero-padded images, per-element flat (H+2)*(W+2)
                              segments padded to a multiple of 128 lanes
    w1_ref:   (Cmid, 9*Cin)   BN-scale-folded 3x3 weights, column t*Cin+c for
                              tap t = ky*3 + kx, input channel c
    b1_ref:   (Cmid, 1)       folded BN bias = beta - mean * scale
    w2_ref:   (Cout, Cmid)    1x1 conv weights
    b2_ref:   (Cout, 1)       1x1 conv bias
    o_ref:    (Cout, LANES)   output, same flat padded layout
    taps_ref: (9*Cin, LANES)  VMEM scratch holding the stacked rolled taps
    """
    cin = x_ref.shape[0]
    lanes = x_ref.shape[1]

    x = x_ref[...]                                   # (Cin, LANES)

    # Build the stacked 3x3 taps: each tap is a lane-rotation of the flat
    # padded image (XLU).  Wrapped / out-of-window lanes only land on border
    # or lane-pad positions, which the wrapper discards.
    for ky in range(3):
        for kx in range(3):
            t = ky * 3 + kx
            shift = (ky - 1) * wp + (kx - 1)
            tap = x if shift == 0 else pltpu.roll(x, (-shift) % lanes, 1)
            taps_ref[t * cin:(t + 1) * cin, :] = tap

    # 3x3 conv (BN scale folded into weights) as ONE K=9*Cin matmul, then
    # BN bias + ReLU.
    y = jnp.dot(w1_ref[...], taps_ref[...], preferred_element_type=jnp.float32)
    y = jnp.maximum(y + b1_ref[...], 0.0)
    # Dropout2d: identity in eval mode.
    # TODO(synk): training-mode channel dropout / batch-stats BN not implemented.

    # 1x1 conv with bias == matmul over channels; store straight to o_ref.
    z = jnp.dot(w2_ref[...], y, preferred_element_type=jnp.float32) + b2_ref[...]
    o_ref[...] = z.astype(o_ref.dtype)


@functools.partial(jax.jit, static_argnames=("num_batch_blocks",))
def reion_forward_nchw(x_nchw, w1_oihw, bn_gamma, bn_beta, bn_mean, bn_var,
                       w2_oihw, b2, eps=1e-5, *, num_batch_blocks=1):
    """Forward pass matching ReionModule (eval mode). Input/output are NCHW.

    num_batch_blocks: grid steps (batch split).  1 is best on v5e/v6e; 2 lets
    v7x's two TensorCores both get work when N >= 2.
    """
    N, Cin, H, W = x_nchw.shape
    Cmid = w1_oihw.shape[0]
    Cout = w2_oihw.shape[0]
    Hp, Wp = H + 2, W + 2
    L = Hp * Wp
    Lpad = ((L + 127) // 128) * 128          # per-element lane-dense segment
    assert N % num_batch_blocks == 0
    bb = N // num_batch_blocks               # batch elements per grid step
    lanes_blk = bb * Lpad
    Ltot = N * Lpad

    # --- wrapper glue: fold batch into the lane axis, pad + flatten spatial ---
    x_cn = jnp.transpose(x_nchw, (1, 0, 2, 3))                     # (Cin, N, H, W)
    x_pad = jnp.pad(x_cn, ((0, 0), (0, 0), (1, 1), (1, 1)))        # conv pad=1
    x_flat = jnp.pad(x_pad.reshape(Cin, N, L),
                     ((0, 0), (0, 0), (0, Lpad - L)))              # (Cin, N, Lpad)
    x_folded = x_flat.reshape(Cin, Ltot)                           # (Cin, N*Lpad)

    # Fold BN scale into the 3x3 weights; build the fused (Cmid, 9*Cin) matrix.
    scale = bn_gamma * lax.rsqrt(bn_var + eps)                     # (Cmid,)
    w1_folded = w1_oihw * scale[:, None, None, None]               # (Cmid,Cin,3,3)
    w1_mat = jnp.transpose(w1_folded, (0, 2, 3, 1)).reshape(Cmid, 9 * Cin)
    b1 = (bn_beta - bn_mean * scale).reshape(Cmid, 1)
    w2_m = w2_oihw.reshape(Cout, Cmid)
    b2_m = b2.reshape(Cout, 1)

    flops = 2 * (9 * Cin * Cmid + Cmid * Cout) * Ltot
    bytes_accessed = 4 * (x_folded.size + w1_mat.size + b1.size
                          + w2_m.size + b2_m.size + Cout * Ltot)

    out_folded = pl.pallas_call(
        functools.partial(_reion_kernel, wp=Wp),
        out_shape=jax.ShapeDtypeStruct((Cout, Ltot), x_nchw.dtype),
        grid_spec=pltpu.PrefetchScalarGridSpec(
            num_scalar_prefetch=0,
            grid=(num_batch_blocks,),
            in_specs=[
                pl.BlockSpec((Cin, lanes_blk), lambda i: (0, i)),
                pl.BlockSpec((Cmid, 9 * Cin), lambda i: (0, 0)),
                pl.BlockSpec((Cmid, 1), lambda i: (0, 0)),
                pl.BlockSpec((Cout, Cmid), lambda i: (0, 0)),
                pl.BlockSpec((Cout, 1), lambda i: (0, 0)),
            ],
            out_specs=pl.BlockSpec((Cout, lanes_blk), lambda i: (0, i)),
            scratch_shapes=[pltpu.VMEM((9 * Cin, lanes_blk), jnp.float32)],
        ),
        compiler_params=pltpu.CompilerParams(
            dimension_semantics=("parallel",)),
        cost_estimate=pl.CostEstimate(flops=flops, transcendentals=0,
                                      bytes_accessed=bytes_accessed),
    )(x_folded, w1_mat, b1, w2_m, b2_m)

    # Drop lane padding and the conv halo, restore NCHW (tiny strided copies).
    out = out_folded.reshape(Cout, N, Lpad)[:, :, :L]
    out = out.reshape(Cout, N, Hp, Wp)[:, :, 1:-1, 1:-1]
    return jnp.transpose(out, (1, 0, 2, 3))


def _reference_nchw(x_nchw, w1_oihw, bn_gamma, bn_beta, bn_mean, bn_var,
                    w2_oihw, b2, eps=1e-5):
    """Pure-JAX reference (lax conv) for correctness checking."""
    y = lax.conv_general_dilated(
        x_nchw, w1_oihw, window_strides=(1, 1), padding=((1, 1), (1, 1)),
        dimension_numbers=("NCHW", "OIHW", "NCHW"))
    scale = (bn_gamma / jnp.sqrt(bn_var + eps)).reshape(1, -1, 1, 1)
    bias = (bn_beta - bn_mean * bn_gamma / jnp.sqrt(bn_var + eps)).reshape(1, -1, 1, 1)
    y = jnp.maximum(y * scale + bias, 0.0)
    z = lax.conv_general_dilated(
        y, w2_oihw, window_strides=(1, 1), padding=((0, 0), (0, 0)),
        dimension_numbers=("NCHW", "OIHW", "NCHW"))
    return z + b2.reshape(1, -1, 1, 1)


if __name__ == "__main__":
    # Small shapes consistent with the module: N=2, in=4, mid=8, out=4, 16x16.
    N, Cin, Cmid, Cout, H, W = 2, 4, 8, 4, 16, 16

    key = jax.random.PRNGKey(0)
    k = jax.random.split(key, 8)

    x = jax.random.normal(k[0], (N, Cin, H, W), jnp.float32)

    # Deterministic synthetic parameters (PyTorch shapes).
    w1 = jax.random.normal(k[1], (Cmid, Cin, 3, 3), jnp.float32) * 0.1   # Conv2d(3x3, bias=False)
    gamma = 1.0 + 0.1 * jax.random.normal(k[2], (Cmid,), jnp.float32)    # BatchNorm2d weight
    beta = 0.1 * jax.random.normal(k[3], (Cmid,), jnp.float32)           # BatchNorm2d bias
    rmean = 0.05 * jax.random.normal(k[4], (Cmid,), jnp.float32)         # running_mean
    rvar = 1.0 + 0.1 * jax.nn.softplus(jax.random.normal(k[5], (Cmid,), jnp.float32))  # running_var > 0
    w2 = jax.random.normal(k[6], (Cout, Cmid, 1, 1), jnp.float32) * 0.2  # Conv2d(1x1, bias=True)
    b2 = 0.1 * jax.random.normal(k[7], (Cout,), jnp.float32)

    out = reion_forward_nchw(x, w1, gamma, beta, rmean, rvar, w2, b2)
    out = jax.block_until_ready(out)

    ref = _reference_nchw(x, w1, gamma, beta, rmean, rvar, w2, b2)
    assert out.shape == (N, Cout, H, W), out.shape
    assert jnp.allclose(out, ref, atol=1e-4, rtol=1e-4), float(jnp.max(jnp.abs(out - ref)))

    print("KERNEL_OK")
</pallas_src>

<mosaic_0001>
module attributes {stable_mosaic.version = 11 : i64} {
  func.func @_reion_kernel(%arg0: i32, %arg1: memref<4x768xf32, #tpu.memory_space<vmem>>, %arg2: memref<8x36xf32, #tpu.memory_space<vmem>>, %arg3: memref<8x1xf32, #tpu.memory_space<vmem>>, %arg4: memref<4x8xf32, #tpu.memory_space<vmem>>, %arg5: memref<4x1xf32, #tpu.memory_space<vmem>>, %arg6: memref<4x768xf32, #tpu.memory_space<vmem>>, %arg7: memref<36x768xf32, #tpu.memory_space<vmem>>) attributes {dimension_semantics = [#tpu.dimension_semantics<parallel>], iteration_bounds = array<i64: 1>, scalar_prefetch = 0 : i64, scratch_operands = 1 : i64, tpu.core_type = #tpu.core_type<tc>, window_params = [{transform_indices = @transform_0, window_bounds = array<i64: 4, 768>}, {pipeline_mode = #tpu.pipeline_mode<synchronous>, transform_indices = @transform_1, window_bounds = array<i64: 8, 36>}, {pipeline_mode = #tpu.pipeline_mode<synchronous>, transform_indices = @transform_2, window_bounds = array<i64: 8, 1>}, {pipeline_mode = #tpu.pipeline_mode<synchronous>, transform_indices = @transform_3, window_bounds = array<i64: 4, 8>}, {pipeline_mode = #tpu.pipeline_mode<synchronous>, transform_indices = @transform_4, window_bounds = array<i64: 4, 1>}, {transform_indices = @transform_5, window_bounds = array<i64: 4, 768>}]} {
    %c0 = arith.constant 0 : index
    %c0_0 = arith.constant 0 : index
    %0 = vector.load %arg1[%c0, %c0_0] : memref<4x768xf32, #tpu.memory_space<vmem>>, vector<4x768xf32>
    %c19_i32 = arith.constant 19 : i32
    %1 = tpu.dynamic_rotate %0 by %c19_i32 dim 1 : vector<4x768xf32>, i32 -> vector<4x768xf32>
    %c0_1 = arith.constant 0 : index
    %c0_2 = arith.constant 0 : index
    %2 = vector.load %arg7[%c0_1, %c0_2] : memref<36x768xf32, #tpu.memory_space<vmem>>, vector<4x768xf32>
    tpu.vector_store %arg7[%c0_1, %c0_2], %1 {strides = array<i32>} : memref<36x768xf32, #tpu.memory_space<vmem>>, vector<4x768xf32>,
    %c18_i32 = arith.constant 18 : i32
    %3 = tpu.dynamic_rotate %0 by %c18_i32 dim 1 : vector<4x768xf32>, i32 -> vector<4x768xf32>
    %c4 = arith.constant 4 : index
    %c0_3 = arith.constant 0 : index
    %4 = vector.load %arg7[%c4, %c0_3] : memref<36x768xf32, #tpu.memory_space<vmem>>, vector<4x768xf32>
    tpu.vector_store %arg7[%c4, %c0_3], %3 {strides = array<i32>} : memref<36x768xf32, #tpu.memory_space<vmem>>, vector<4x768xf32>,
    %c17_i32 = arith.constant 17 : i32
    %5 = tpu.dynamic_rotate %0 by %c17_i32 dim 1 : vector<4x768xf32>, i32 -> vector<4x768xf32>
    %c8 = arith.constant 8 : index
    %c0_4 = arith.constant 0 : index
    %6 = vector.load %arg7[%c8, %c0_4] : memref<36x768xf32, #tpu.memory_space<vmem>>, vector<4x768xf32>
    tpu.vector_store %arg7[%c8, %c0_4], %5 {strides = array<i32>} : memref<36x768xf32, #tpu.memory_space<vmem>>, vector<4x768xf32>,
    %c1_i32 = arith.constant 1 : i32
    %7 = tpu.dynamic_rotate %0 by %c1_i32 dim 1 : vector<4x768xf32>, i32 -> vector<4x768xf32>
    %c12 = arith.constant 12 : index
    %c0_5 = arith.constant 0 : index
    %8 = vector.load %arg7[%c12, %c0_5] : memref<36x768xf32, #tpu.memory_space<vmem>>, vector<4x768xf32>
    tpu.vector_store %arg7[%c12, %c0_5], %7 {strides = array<i32>} : memref<36x768xf32, #tpu.memory_space<vmem>>, vector<4x768xf32>,
    %c16 = arith.constant 16 : index
    %c0_6 = arith.constant 0 : index
    %9 = vector.load %arg7[%c16, %c0_6] : memref<36x768xf32, #tpu.memory_space<vmem>>, vector<4x768xf32>
    tpu.vector_store %arg7[%c16, %c0_6], %0 {strides = array<i32>} : memref<36x768xf32, #tpu.memory_space<vmem>>, vector<4x768xf32>,
    %c767_i32 = arith.constant 767 : i32
    %10 = tpu.dynamic_rotate %0 by %c767_i32 dim 1 : vector<4x768xf32>, i32 -> vector<4x768xf32>
    %c20 = arith.constant 20 : index
    %c0_7 = arith.constant 0 : index
    %11 = vector.load %arg7[%c20, %c0_7] : memref<36x768xf32, #tpu.memory_space<vmem>>, vector<4x768xf32>
    tpu.vector_store %arg7[%c20, %c0_7], %10 {strides = array<i32>} : memref<36x768xf32, #tpu.memory_space<vmem>>, vector<4x768xf32>,
    %c751_i32 = arith.constant 751 : i32
    %12 = tpu.dynamic_rotate %0 by %c751_i32 dim 1 : vector<4x768xf32>, i32 -> vector<4x768xf32>
    %c24 = arith.constant 24 : index
    %c0_8 = arith.constant 0 : index
    %13 = vector.load %arg7[%c24, %c0_8] : memref<36x768xf32, #tpu.memory_space<vmem>>, vector<4x768xf32>
    tpu.vector_store %arg7[%c24, %c0_8], %12 {strides = array<i32>} : memref<36x768xf32, #tpu.memory_space<vmem>>, vector<4x768xf32>,
    %c750_i32 = arith.constant 750 : i32
    %14 = tpu.dynamic_rotate %0 by %c750_i32 dim 1 : vector<4x768xf32>, i32 -> vector<4x768xf32>
    %c28 = arith.constant 28 : index
    %c0_9 = arith.constant 0 : index
    %15 = vector.load %arg7[%c28, %c0_9] : memref<36x768xf32, #tpu.memory_space<vmem>>, vector<4x768xf32>
    tpu.vector_store %arg7[%c28, %c0_9], %14 {strides = array<i32>} : memref<36x768xf32, #tpu.memory_space<vmem>>, vector<4x768xf32>,
    %c749_i32 = arith.constant 749 : i32
    %16 = tpu.dynamic_rotate %0 by %c749_i32 dim 1 : vector<4x768xf32>, i32 -> vector<4x768xf32>
    %c32 = arith.constant 32 : index
    %c0_10 = arith.constant 0 : index
    %17 = vector.load %arg7[%c32, %c0_10] : memref<36x768xf32, #tpu.memory_space<vmem>>, vector<4x768xf32>
    tpu.vector_store %arg7[%c32, %c0_10], %16 {strides = array<i32>} : memref<36x768xf32, #tpu.memory_space<vmem>>, vector<4x768xf32>,
    %c0_11 = arith.constant 0 : index
    %c0_12 = arith.constant 0 : index
    %18 = vector.load %arg2[%c0_11, %c0_12] : memref<8x36xf32, #tpu.memory_space<vmem>>, vector<8x36xf32>
    %c0_13 = arith.constant 0 : index
    %c0_14 = arith.constant 0 : index
    %19 = vector.load %arg7[%c0_13, %c0_14] : memref<36x768xf32, #tpu.memory_space<vmem>>, vector<36x768xf32>
    %cst = arith.constant dense<0.000000e+00> : vector<8x768xf32>
    %20 = tpu.matmul %18, %19, %cst {dimension_numbers = #tpu.dot_dimension_numbers<[1], [0], [0], [1], [0, 0, 1, 1], [], []>} : vector<8x36xf32>, vector<36x768xf32>, vector<8x768xf32> -> vector<8x768xf32>
    %c0_15 = arith.constant 0 : index
    %c0_16 = arith.constant 0 : index
    %21 = vector.load %arg3[%c0_15, %c0_16] : memref<8x1xf32, #tpu.memory_space<vmem>>, vector<8x1xf32>
    %22 = vector.broadcast %21 : vector<8x1xf32> to vector<8x768xf32>
    %23 = arith.addf %20, %22 : vector<8x768xf32>
    %cst_17 = arith.constant 0.000000e+00 : f32
    %24 = vector.broadcast %cst_17 : f32 to vector<8x768xf32>
    %25 = arith.maximumf %23, %24 : vector<8x768xf32>
    %c0_18 = arith.constant 0 : index
    %c0_19 = arith.constant 0 : index
    %26 = vector.load %arg4[%c0_18, %c0_19] : memref<4x8xf32, #tpu.memory_space<vmem>>, vector<4x8xf32>
    %cst_20 = arith.constant dense<0.000000e+00> : vector<4x768xf32>
    %27 = tpu.matmul %26, %25, %cst_20 {dimension_numbers = #tpu.dot_dimension_numbers<[1], [0], [0], [1], [0, 0, 1, 1], [], []>} : vector<4x8xf32>, vector<8x768xf32>, vector<4x768xf32> -> vector<4x768xf32>
    %c0_21 = arith.constant 0 : index
    %c0_22 = arith.constant 0 : index
    %28 = vector.load %arg5[%c0_21, %c0_22] : memref<4x1xf32, #tpu.memory_space<vmem>>, vector<4x1xf32>
    %29 = vector.broadcast %28 : vector<4x1xf32> to vector<4x768xf32>
    %30 = arith.addf %27, %29 : vector<4x768xf32>
    %c0_23 = arith.constant 0 : index
    %c0_24 = arith.constant 0 : index
    %31 = vector.load %arg6[%c0_23, %c0_24] : memref<4x768xf32, #tpu.memory_space<vmem>>, vector<4x768xf32>
    tpu.vector_store %arg6[%c0_23, %c0_24], %30 {strides = array<i32>} : memref<4x768xf32, #tpu.memory_space<vmem>>, vector<4x768xf32>,
    return
  }
  func.func @transform_0(%arg0: i32) -> (i32, i32) {
    %c0_i32 = arith.constant 0 : i32
    %c0_i32_0 = arith.constant 0 : i32
    return %c0_i32, %arg0 : i32, i32
  }
  func.func @transform_1(%arg0: i32) -> (i32, i32) {
    %c0_i32 = arith.constant 0 : i32
    %c0_i32_0 = arith.constant 0 : i32
    %c0_i32_1 = arith.constant 0 : i32
    return %c0_i32, %c0_i32_0 : i32, i32
  }
  func.func @transform_2(%arg0: i32) -> (i32, i32) {
    %c0_i32 = arith.constant 0 : i32
    %c0_i32_0 = arith.constant 0 : i32
    %c0_i32_1 = arith.constant 0 : i32
    return %c0_i32, %c0_i32_0 : i32, i32
  }
  func.func @transform_3(%arg0: i32) -> (i32, i32) {
    %c0_i32 = arith.constant 0 : i32
    %c0_i32_0 = arith.constant 0 : i32
    %c0_i32_1 = arith.constant 0 : i32
    return %c0_i32, %c0_i32_0 : i32, i32
  }
  func.func @transform_4(%arg0: i32) -> (i32, i32) {
    %c0_i32 = arith.constant 0 : i32
    %c0_i32_0 = arith.constant 0 : i32
    %c0_i32_1 = arith.constant 0 : i32
    return %c0_i32, %c0_i32_0 : i32, i32
  }
  func.func @transform_5(%arg0: i32) -> (i32, i32) {
    %c0_i32 = arith.constant 0 : i32
    %c0_i32_0 = arith.constant 0 : i32
    return %c0_i32, %arg0 : i32, i32
  }
}

</mosaic_0001>

<bundles_post_ra>
// kernel: reion_forward_nchw.1
= control target key start
LH: loop header
LB: loop body
LE: loop exit
PB: predicated region body
PF: predicated region fallthrough
CT: control target
= control target key end

     0   :  { %s827_s24 = smov 19   ;;  %s829_s25 = smov 17   ;;  %v55_v59 = vlaneseq  ;;  %vm500_vm7 = vcmask 1043456   ;;  %vm496_vm9 = vcmask 293888   ;;  %vm652_vm10 = vcmask 64512   ;;  %s1222_s0 = inlined_call_operand.vmem [shape: f32[4,768], index: 0, kind: input, shape index: {}]   ;;  %s1223_s1 = inlined_call_operand.vmem [shape: f32[8,36], index: 1, kind: input, shape index: {}]   ;;  %s1224_s2 = inlined_call_operand.vmem [shape: f32[8,1], index: 2, kind: input, shape index: {}]   ;;  %s1225_s3 = inlined_call_operand.vmem [shape: f32[4,8], index: 3, kind: input, shape index: {}]   ;;  %s1226_s4 = inlined_call_operand.vmem [shape: f32[4,1], index: 4, kind: input, shape index: {}]   ;;  %s1227_s5 = inlined_call_operand.vmem [shape: f32[4,768], index: 5, kind: output, shape index: {}]  }
   0x1   :  { %v869_v0 = vld [vmem:[%s1222_s0] sm:$0xff]  ;;  %v874_v1 = vld [vmem:[%s1222_s0 + $0x10] sm:$0xff]  ;;  %v879_v2 = vld [vmem:[%s1222_s0 + $0x8] sm:$0xff]  ;;  %s828_s0 = smov 18   ;;  %s830_s26 = smov 1  }
   0x2   :  { %26 = vst [vmem:[#allocation1] ss:$2 sm:$0xff] %v869_v0  ;;  %s831_s27 = smov 127   ;;  %s832_s28 = smov 111   ;;  %v983_v61 = vand.u32 127, %v55_v59 }
   0x3   :  { %30 = vst [vmem:[#allocation1 + $0x20] ss:$2 sm:$0xff] %v874_v1  ;;  %s833_s29 = smov 110   ;;  %s834_s30 = smov 109  }
   0x4   :  { %28 = vst [vmem:[#allocation1 + $0x10] ss:$2 sm:$0xff] %v879_v2  ;;  %vm99_vm0 = vcmp.lt.s32.totalorder %v983_v61, 18  ;;  %vm159_vm1 = vcmp.lt.s32.totalorder %v983_v61, 17  ;;  %vm201_vm2 = vcmp.lt.s32.totalorder %v983_v61, 1  ;;  %vm284_vm3 = vcmp.lt.s32.totalorder %v983_v61, 127 }
   0x5   :  { %vm344_vm4 = vcmp.lt.s32.totalorder %v983_v61, 111  ;;  %vm386_vm5 = vcmp.lt.s32.totalorder %v983_v61, 110  ;;  %vm446_vm6 = vcmp.lt.s32.totalorder %v983_v61, 109  ;;  %vm57_vm8 = vcmp.lt.s32.totalorder %v983_v61, 19 }
   0x9   :  { %v31_v3 = vld.sshfl [vmem:[#allocation1] sm:$0xff pattern:$0x75316420]  ;;  %v884_v4 = vld.sshfl [vmem:[#allocation1 + $0x8] sm:$0xff pattern:$0x75316420] }
   0xa   :  { %43 = vrot.lane.b32.xlu2 %v31_v3, %s827_s24  ;;  %70 = vst [vmem:[#allocation1] ss:$2 sm:$0xff] %v869_v0  ;;  %v888_v5 = vld.sshfl [vmem:[#allocation1 + $0x20] sm:$0xff pattern:$0x75316420] }
   0xb   :  { %v890_v6 = vld.sshfl [vmem:[#allocation1 + $0x28] sm:$0xff pattern:$0x75316420]  ;;  %v892_v7 = vld.sshfl [vmem:[#allocation1 + $0x10] sm:$0xff pattern:$0x75316420] }
   0xc   :  { %74 = vst [vmem:[#allocation1 + $0x20] ss:$2 sm:$0xff] %v874_v1  ;;  %v895_v8 = vld.sshfl [vmem:[#allocation1 + $0x18] sm:$0xff pattern:$0x75316420] }
   0xd   :  { %72 = vst [vmem:[#allocation1 + $0x10] ss:$2 sm:$0xff] %v879_v2 }
  0x11   :  { %v75_v9 = vld.sshfl [vmem:[#allocation1] sm:$0xff pattern:$0x75316420]  ;;  %v76_v10 = vld.sshfl [vmem:[#allocation1 + $0x8] sm:$0xff pattern:$0x75316420] }
  0x12   :  { %87 = vrot.lane.b32.xlu1 %v75_v9, %s828_s0  ;;  %89 = vrot.lane.b32.xlu2 %v76_v10, %s828_s0  ;;  %130 = vst [vmem:[#allocation1] ss:$2 sm:$0xff] %v869_v0 }
  0x13   :  { %v901_v11 = vld.sshfl [vmem:[#allocation1 + $0x20] sm:$0xff pattern:$0x75316420]  ;;  %v903_v12 = vld.sshfl [vmem:[#allocation1 + $0x28] sm:$0xff pattern:$0x75316420] }
  0x14   :  { %134 = vst [vmem:[#allocation1 + $0x20] ss:$2 sm:$0xff] %v874_v1  ;;  %v906_v13 = vld.sshfl [vmem:[#allocation1 + $0x10] sm:$0xff pattern:$0x75316420] }
  0x15   :  { %v908_v14 = vld.sshfl [vmem:[#allocation1 + $0x18] sm:$0xff pattern:$0x75316420] }
  0x16   :  { %132 = vst [vmem:[#allocation1 + $0x10] ss:$2 sm:$0xff] %v879_v2 }
  0x19   :  { %v136_v15 = vld.sshfl [vmem:[#allocation1 + $0x8] sm:$0xff pattern:$0x75316420]  ;;  %v135_v16 = vld.sshfl [vmem:[#allocation1] sm:$0xff pattern:$0x75316420] }
  0x1a   :  { %149 = vrot.lane.b32.xlu1 %v136_v15, %s829_s25  ;;  %147 = vrot.lane.b32.xlu0 %v135_v16, %s829_s25  ;;  %172 = vst [vmem:[#allocation1] ss:$2 sm:$0xff] %v869_v0 }
  0x1b   :  { %v914_v17 = vld.sshfl [vmem:[#allocation1 + $0x20] sm:$0xff pattern:$0x75316420]  ;;  %v916_v18 = vld.sshfl [vmem:[#allocation1 + $0x28] sm:$0xff pattern:$0x75316420] }
  0x1c   :  { %176 = vst [vmem:[#allocation1 + $0x20] ss:$2 sm:$0xff] %v874_v1 }
  0x1d   :  { %v919_v19 = vld.sshfl [vmem:[#allocation1 + $0x10] sm:$0xff pattern:$0x75316420]  ;;  %v921_v20 = vld.sshfl [vmem:[#allocation1 + $0x18] sm:$0xff pattern:$0x75316420] }
  0x1e   :  { %174 = vst [vmem:[#allocation1 + $0x10] ss:$2 sm:$0xff] %v879_v2 }
  0x21   :  { %v178_v21 = vld.sshfl [vmem:[#allocation1 + $0x8] sm:$0xff pattern:$0x75316420]  ;;  %v177_v22 = vld.sshfl [vmem:[#allocation1] sm:$0xff pattern:$0x75316420] }
  0x22   :  { %191 = vrot.lane.b32.xlu0 %v178_v21, %s830_s26  ;;  %189 = vrot.lane.b32.xlu2 %v177_v22, %s830_s26  ;;  %232 = vst [vmem:[#allocation1] ss:$2 sm:$0xff] %v869_v0 }
  0x23   :  { %v927_v23 = vld.sshfl [vmem:[#allocation1 + $0x20] sm:$0xff pattern:$0x75316420]  ;;  %v182_v24 = vld.sshfl [vmem:[#allocation1 + $0x28] sm:$0xff pattern:$0x75316420] }
  0x24   :  { %236 = vst [vmem:[#allocation1 + $0x20] ss:$2 sm:$0xff] %v874_v1  ;;  %199 = vrot.lane.b32.xlu1 %v182_v24, %s830_s26 }
  0x25   :  { %v180_v25 = vld.sshfl [vmem:[#allocation1 + $0x18] sm:$0xff pattern:$0x75316420]  ;;  %v179_v26 = vld.sshfl [vmem:[#allocation1 + $0x10] sm:$0xff pattern:$0x75316420] }
  0x26   :  { %234 = vst [vmem:[#allocation1 + $0x10] ss:$2 sm:$0xff] %v879_v2 }
  0x29   :  { %v237_v27 = vld.sshfl [vmem:[#allocation1] sm:$0xff pattern:$0x75316420]  ;;  %v238_v28 = vld.sshfl [vmem:[#allocation1 + $0x8] sm:$0xff pattern:$0x75316420] }
  0x2a   :  { %249 = vst [vmem:[#allocation2 + $0x60] sm:$0xf] %v237_v27  ;;  %195 = vrot.lane.b32.xlu0 %v180_v25, %s830_s26  ;;  %193 = vrot.lane.b32.xlu2 %v179_v26, %s830_s26 }
  0x2b   :  { %250 = vst [vmem:[#allocation2 + $0xa8] sm:$0xf] %v238_v28  ;;  %v241_v29 = vld.sshfl [vmem:[#allocation1 + $0x20] sm:$0xff pattern:$0x75316420] }
  0x2c   :  { %255 = vst [vmem:[#allocation1] ss:$2 sm:$0xff] %v869_v0  ;;  %v242_v30 = vld.sshfl [vmem:[#allocation1 + $0x28] sm:$0xff pattern:$0x75316420] }
  0x2d   :  { %253 = vst [vmem:[#allocation2 + $0x8] sm:$0xf] %v241_v29  ;;  %v239_v31 = vld.sshfl [vmem:[#allocation1 + $0x10] sm:$0xff pattern:$0x75316420] }
  0x2e   :  { %254 = vst [vmem:[#allocation2 + $0x78] sm:$0xf] %v242_v30  ;;  %v240_v32 = vld.sshfl [vmem:[#allocation1 + $0x18] sm:$0xff pattern:$0x75316420] }
  0x2f   :  { %259 = vst [vmem:[#allocation1 + $0x20] ss:$2 sm:$0xff] %v874_v1 }
  0x30   :  { %251 = vst [vmem:[#allocation2 + $0x70] sm:$0xf] %v239_v31 }
  0x31   :  { %252 = vst [vmem:[#allocation2 + $0x40] sm:$0xf] %v240_v32 }
  0x32   :  { %257 = vst [vmem:[#allocation1 + $0x10] ss:$2 sm:$0xff] %v879_v2 }
  0x33   :  { %v261_v33 = vld.sshfl [vmem:[#allocation1 + $0x8] sm:$0xff pattern:$0x75316420]  ;;  %v260_v34 = vld.sshfl [vmem:[#allocation1] sm:$0xff pattern:$0x75316420] }
  0x34   :  { %274 = vrot.lane.b32.xlu2 %v261_v33, %s831_s27  ;;  %272 = vrot.lane.b32.xlu1 %v260_v34, %s831_s27  ;;  %315 = vst [vmem:[#allocation1] ss:$2 sm:$0xff] %v869_v0 }
  0x36   :  { %v264_v35 = vld.sshfl [vmem:[#allocation1 + $0x20] sm:$0xff pattern:$0x75316420]  ;;  %v940_v36 = vld.sshfl [vmem:[#allocation1 + $0x28] sm:$0xff pattern:$0x75316420] }
  0x37   :  { %280 = vrot.lane.b32.xlu0 %v264_v35, %s831_s27  ;;  %319 = vst [vmem:[#allocation1 + $0x20] ss:$2 sm:$0xff] %v874_v1 }
  0x39   :  { %v262_v37 = vld.sshfl [vmem:[#allocation1 + $0x10] sm:$0xff pattern:$0x75316420]  ;;  %v263_v38 = vld.sshfl [vmem:[#allocation1 + $0x18] sm:$0xff pattern:$0x75316420] }
  0x3a   :  { %317 = vst [vmem:[#allocation1 + $0x10] ss:$2 sm:$0xff] %v879_v2 }
  0x3b   :  { %v321_v39 = vld.sshfl [vmem:[#allocation1 + $0x8] sm:$0xff pattern:$0x75316420]  ;;  %v320_v40 = vld.sshfl [vmem:[#allocation1] sm:$0xff pattern:$0x75316420] }
  0x3c   :  { %276 = vrot.lane.b32.xlu2 %v262_v37, %s831_s27  ;;  %357 = vst [vmem:[#allocation1] ss:$2 sm:$0xff] %v869_v0 }
  0x3e   :  { %v324_v41 = vld.sshfl [vmem:[#allocation1 + $0x20] sm:$0xff pattern:$0x75316420]  ;;  %v947_v42 = vld.sshfl [vmem:[#allocation1 + $0x28] sm:$0xff pattern:$0x75316420] }
  0x3f   :  { %334 = vrot.lane.b32.xlu0 %v321_v39, %s832_s28  ;;  %361 = vst [vmem:[#allocation1 + $0x20] ss:$2 sm:$0xff] %v874_v1 }
  0x41   :  { %v322_v43 = vld.sshfl [vmem:[#allocation1 + $0x10] sm:$0xff pattern:$0x75316420]  ;;  %v323_v44 = vld.sshfl [vmem:[#allocation1 + $0x18] sm:$0xff pattern:$0x75316420] }
  0x42   :  { %336 = vrot.lane.b32.xlu1 %v322_v43, %s832_s28  ;;  %359 = vst [vmem:[#allocation1 + $0x10] ss:$2 sm:$0xff] %v879_v2 }
  0x43   :  { %v363_v45 = vld.sshfl [vmem:[#allocation1 + $0x8] sm:$0xff pattern:$0x75316420]  ;;  %v362_v46 = vld.sshfl [vmem:[#allocation1] sm:$0xff pattern:$0x75316420] }
  0x44   :  { %278 = vrot.lane.b32.xlu2 %v263_v38, %s831_s27  ;;  %417 = vst [vmem:[#allocation1] ss:$2 sm:$0xff] %v869_v0 }
  0x46   :  { %v366_v47 = vld.sshfl [vmem:[#allocation1 + $0x20] sm:$0xff pattern:$0x75316420]  ;;  %v367_v48 = vld.sshfl [vmem:[#allocation1 + $0x28] sm:$0xff pattern:$0x75316420] }
  0x47   :  { %340 = vrot.lane.b32.xlu0 %v324_v41, %s832_s28  ;;  %421 = vst [vmem:[#allocation1 + $0x20] ss:$2 sm:$0xff] %v874_v1 }
  0x49   :  { %v364_v49 = vld.sshfl [vmem:[#allocation1 + $0x10] sm:$0xff pattern:$0x75316420]  ;;  %v365_v50 = vld.sshfl [vmem:[#allocation1 + $0x18] sm:$0xff pattern:$0x75316420] }
  0x4a   :  { %332 = vrot.lane.b32.xlu1 %v320_v40, %s832_s28  ;;  %419 = vst [vmem:[#allocation1 + $0x10] ss:$2 sm:$0xff] %v879_v2 }
  0x4b   :  { %v423_v51 = vld.sshfl [vmem:[#allocation1 + $0x8] sm:$0xff pattern:$0x75316420]  ;;  %v422_v52 = vld.sshfl [vmem:[#allocation1] sm:$0xff pattern:$0x75316420] }
  0x4c   :  { %338 = vrot.lane.b32.xlu2 %v323_v44, %s832_s28 }
  0x4e   :  { %v426_v55 = vld.sshfl [vmem:[#allocation1 + $0x20] sm:$0xff pattern:$0x75316420]  ;;  %v427_v58 = vld.sshfl [vmem:[#allocation1 + $0x28] sm:$0xff pattern:$0x75316420] }
  0x4f   :  { %376 = vrot.lane.b32.xlu0 %v363_v45, %s833_s29 }
  0x51   :  { %v424_v53 = vld.sshfl [vmem:[#allocation1 + $0x10] sm:$0xff pattern:$0x75316420]  ;;  %v425_v54 = vld.sshfl [vmem:[#allocation1 + $0x18] sm:$0xff pattern:$0x75316420] }
  0x52   :  { %382 = vrot.lane.b32.xlu1 %v366_v47, %s833_s29 }
  0x54   :  { %374 = vrot.lane.b32.xlu2 %v362_v46, %s833_s29 }
  0x57   :  { %378 = vrot.lane.b32.xlu0 %v364_v49, %s833_s29 }
  0x5a   :  { %436 = vrot.lane.b32.xlu1 %v423_v51, %s834_s30 }
  0x5c   :  { %434 = vrot.lane.b32.xlu2 %v422_v52, %s834_s30 }
  0x5f   :  { %380 = vrot.lane.b32.xlu0 %v365_v50, %s833_s29 }
  0x62   :  { %438 = vrot.lane.b32.xlu1 %v424_v53, %s834_s30 }
  0x64   :  { %93 = vrot.lane.b32.xlu2 %v908_v14, %s828_s0  ;;  %v967_v56 = vpop.permute.xlu2 %43 }
  0x67   :  { %440 = vrot.lane.b32.xlu0 %v425_v54, %s834_s30 }
  0x6a   :  { %442 = vrot.lane.b32.xlu1 %v426_v55, %s834_s30 }
  0x6c   :  { %153 = vrot.lane.b32.xlu2 %v921_v20, %s829_s25  ;;  %v975_v57 = vpop.permute.xlu2 %89 }
  0x6f   :  { %45 = vrot.lane.b32.xlu0 %v884_v4, %s827_s24 }
  0x72   :  { %91 = vrot.lane.b32.xlu1 %v906_v13, %s828_s0 }
  0x74   :  { %49 = vrot.lane.b32.xlu2 %v895_v8, %s827_s24 }
  0x77   :  { %97 = vrot.lane.b32.xlu0 %v903_v12, %s828_s0 }
  0x7a   :  { %151 = vrot.lane.b32.xlu1 %v919_v19, %s829_s25 }
  0x7c   :  { %444 = vrot.lane.b32.xlu2 %v427_v58, %s834_s30  ;;  %v190_v60 = vpop.permute.xlu2 %189 }
  0x7f   :  { %157 = vrot.lane.b32.xlu0 %v916_v18, %s829_s25 }
  0x82   :  { %47 = vrot.lane.b32.xlu1 %v892_v7, %s827_s24 }
  0x84   :  { %197 = vrot.lane.b32.xlu2 %v927_v23, %s830_s26  ;;  %v992_v62 = vpop.permute.xlu1 %87  ;;  %v194_v63 = vpop.permute.xlu2 %193 }
  0x85   :  { %v104_v0 = vsel %vm99_vm0, %v992_v62, %v975_v57 }
  0x86   :  { %v113_v1 = vrot.slane %v104_v0, 4 }
  0x87   :  { %53 = vrot.lane.b32.xlu0 %v890_v6, %s827_s24 }
  0x88   :  { %125 = vst [vmem:[#allocation2] sm:$0xf0] %v113_v1 }
  0x8a   :  { %384 = vrot.lane.b32.xlu1 %v367_v48, %s833_s29 }
  0x8c   :  { %v1002_v2 = vpop.permute.xlu1 %149  ;;  %v1004_v3 = vpop.permute.xlu0 %147  ;;  %51 = vrot.lane.b32.xlu2 %v888_v5, %s827_s24 }
  0x8d   :  { %v164_v4 = vsel %vm159_vm1, %v1004_v3, %v1002_v2 }
  0x8e   :  { %167 = vst [vmem:[#allocation2 + $0x48] sm:$0xf] %v164_v4  ;;  %v275_v7 = vpop.permute.xlu2 %274 }
  0x8f   :  { %282 = vrot.lane.b32.xlu0 %v940_v36, %s831_s27 }
  0x92   :  { %342 = vrot.lane.b32.xlu1 %v947_v42, %s832_s28 }
  0x94   :  { %v192_v6 = vpop.permute.xlu0 %191 }
  0x95   :  { %v205_v8 = vsel %vm201_vm2, %v192_v6, %v194_v63  ;;  %v206_v5 = vsel %vm201_vm2, %v190_v60, %v192_v6 }
  0x96   :  { %v215_v9 = vrot.slane %v206_v5, 4  ;;  %v216_v10 = vrot.slane %v205_v8, 4  ;;  %v277_v12 = vpop.permute.xlu2 %276  ;;  %v1022_v13 = vpop.permute.xlu1 %199 }
  0x97   :  { %95 = vrot.lane.b32.xlu0 %v901_v11, %s828_s0  ;;  %v288_v14 = vsel %vm284_vm3, %v275_v7, %v277_v12  ;;  %v207_v15 = vsel %vm201_vm2, %v1022_v13, %v190_v60 }
  0x98   :  { %227 = vst [vmem:[#allocation2 + $0x48] sm:$0xf0] %v215_v9  ;;  %v298_v16 = vrot.slane %v288_v14, 4  ;;  %v214_v18 = vrot.slane %v207_v15, 4 }
  0x99   :  { %228 = vst [vmem:[#allocation2 + $0x80] sm:$0xf0] %v216_v10 }
  0x9a   :  { %155 = vrot.lane.b32.xlu1 %v914_v17, %s829_s25  ;;  %310 = vst [vmem:[#allocation2 + $0xa8] sm:$0xf0] %v298_v16 }
  0x9b   :  { %226 = vst [vmem:[#allocation2 + $0x30] sm:$0xf0] %v214_v18 }
  0x9c   :  { %v1033_v19 = vpop.permute.xlu0 %195 }
  0x9d   :  { %v204_v11 = vsel %vm201_vm2, %v194_v63, %v1033_v19 }
  0x9e   :  { %v217_v20 = vrot.slane %v204_v11, 4  ;;  %v279_v21 = vpop.permute.xlu2 %278 }
  0x9f   :  { %v287_v22 = vsel %vm284_vm3, %v277_v12, %v279_v21 }
  0xa0   :  { %229 = vst [vmem:[#allocation2 + $0x88] sm:$0xf0] %v217_v20  ;;  %v299_v23 = vrot.slane %v287_v22, 4 }
  0xa1   :  { %v473_v22 = vld [vmem:[#allocation2 + $0xa8] sm:$0xff] }
  0xa2   :  { %311 = vst [vmem:[#allocation2 + $0x70] sm:$0xf0] %v299_v23 }
  0xa6   :  { %v339_v24 = vpop.permute.xlu2 %338  ;;  %v1040_v25 = vpop.permute.xlu1 %272 }
  0xa7   :  { %v289_v17 = vsel %vm284_vm3, %v1040_v25, %v275_v7 }
  0xa8   :  { %v297_v26 = vrot.slane %v289_v17, 4 }
  0xa9   :  { %v1045_v27 = vpop.permute.xlu0 %280 }
  0xaa   :  { %v286_v28 = vsel %vm284_vm3, %v279_v21, %v1045_v27  ;;  %309 = vst [vmem:[#allocation2 + $0x60] sm:$0xf0] %v297_v26 }
  0xab   :  { %v300_v29 = vrot.slane %v286_v28, 4 }
  0xad   :  { %312 = vst [vmem:[#allocation2 + $0x40] sm:$0xf0] %v300_v29 }
  0xae   :  { %v1050_v30 = vpop.permute.xlu2 %374 }
  0xb1   :  { %v335_v31 = vpop.permute.xlu0 %334  ;;  %v472_v7 = vld [vmem:[#allocation2 + $0x60] sm:$0xff] }
  0xb4   :  { %v337_v32 = vpop.permute.xlu1 %336 }
  0xb5   :  { %v347_v33 = vsel %vm344_vm4, %v337_v32, %v339_v24  ;;  %v348_v34 = vsel %vm344_vm4, %v335_v31, %v337_v32 }
  0xb6   :  { %353 = vst [vmem:[#allocation2 + $0x38] sm:$0xf] %v347_v33  ;;  %v435_v35 = vpop.permute.xlu2 %434  ;;  %v474_v33 = vld [vmem:[#allocation2 + $0x70] sm:$0xff] }
  0xb7   :  { %352 = vst [vmem:[#allocation2 + $0x10] sm:$0xf] %v348_v34 }
  0xb9   :  { %v1057_v36 = vpop.permute.xlu0 %340 }
  0xba   :  { %v346_v37 = vsel %vm344_vm4, %v339_v24, %v1057_v36 }
  0xbb   :  { %354 = vst [vmem:[#allocation2 + $0x28] sm:$0xf] %v346_v37 }
  0xbc   :  { %v1062_v38 = vpop.permute.xlu1 %332 }
  0xbd   :  { %v349_v39 = vsel %vm344_vm4, %v1062_v38, %v335_v31 }
  0xbe   :  { %351 = vst [vmem:[#allocation2 + $0xc0] sm:$0xf] %v349_v39  ;;  %v1067_v40 = vpop.permute.xlu2 %93  ;;  %v475_v39 = vld [vmem:[#allocation2 + $0x40] sm:$0xff] }
  0xc1   :  { %v377_v41 = vpop.permute.xlu0 %376 }
  0xc2   :  { %v391_v42 = vsel %vm386_vm5, %v1050_v30, %v377_v41 }
  0xc3   :  { %v399_v43 = vrot.slane %v391_v42, 4 }
  0xc4   :  { %v1073_v44 = vpop.permute.xlu1 %382 }
  0xc5   :  { %411 = vst [vmem:[#allocation2 + $0xc0] sm:$0xf0] %v399_v43 }
  0xc6   :  { %v1075_v45 = vpop.permute.xlu2 %153 }
  0xc9   :  { %v379_v46 = vpop.permute.xlu0 %378 }
  0xca   :  { %v390_v47 = vsel %vm386_vm5, %v377_v41, %v379_v46 }
  0xcb   :  { %v400_v48 = vrot.slane %v390_v47, 4 }
  0xcc   :  { %v437_v49 = vpop.permute.xlu1 %436  ;;  %v478_v1 = vld [vmem:[#allocation2 + $0xc0] sm:$0xff] }
  0xcd   :  { %412 = vst [vmem:[#allocation2 + $0x10] sm:$0xf0] %v400_v48  ;;  %v451_v50 = vsel %vm446_vm6, %v435_v35, %v437_v49  ;;  %v1132_v48 = vld [vmem:[%s1223_s1] sm:$0xff] }
  0xce   :  { %453 = vst [vmem:[#allocation2 + $0x58] sm:$0xf] %v451_v50  ;;  %v1082_v51 = vpop.permute.xlu2 %49 }
  0xd1   :  { %v381_v52 = vpop.permute.xlu0 %380 }
  0xd2   :  { %v388_v53 = vsel %vm386_vm5, %v381_v52, %v1073_v44  ;;  %v389_v54 = vsel %vm386_vm5, %v379_v46, %v381_v52 }
  0xd3   :  { %v401_v55 = vrot.slane %v389_v54, 4  ;;  %v402_v58 = vrot.slane %v388_v53, 4  ;;  %v490_v53 = vld [vmem:[%s1224_s2] sm:$0xff]  ;;  %v835_v54 = vmov 0  }
  0xd4   :  { %v439_v59 = vpop.permute.xlu1 %438  ;;  %v479_v18 = vld [vmem:[#allocation2 + $0x10] sm:$0xff]  ;;  %825 = vset.pattern.permute.xlu0 %v835_v54  ;;  %826 = vset.pattern.permute.xlu1 %v835_v54 }
  0xd5   :  { %413 = vst [vmem:[#allocation2 + $0x38] sm:$0xf0] %v401_v55  ;;  %v450_v60 = vsel %vm446_vm6, %v437_v49, %v439_v59  ;;  %v484_v63 = vld [vmem:[#allocation2 + $0x58] sm:$0xf]  ;;  %493 = vperm.xlu0 %825, %v490_v53  }
  0xd6   :  { %414 = vst [vmem:[#allocation2 + $0x28] sm:$0xf0] %v402_v58  ;;  %798 = vmatpush.msk.msra.mxu0 %vm500_vm7, %v484_v63  ;;  %v445_v0 = vpop.permute.xlu2 %444 }
  0xd7   :  { %454 = vst [vmem:[#allocation2 + $0xd0] sm:$0xf] %v450_v60  ;;  %v452_v4 = vsel %vm446_vm6, %v445_v0, %v435_v35 }
  0xd8   :  { %531 = vmatpush.msra.mxu0 %v478_v1  ;;  %458 = vst [vmem:[#allocation2 + $0x20] sm:$0xf] %v452_v4 }
  0xd9   :  { %v441_v6 = vpop.permute.xlu0 %440 }
  0xda   :  { %532 = vmatpush.msra.mxu0 %v472_v7  ;;  %v449_v8 = vsel %vm446_vm6, %v439_v59, %v441_v6 }
  0xdb   :  { %455 = vst [vmem:[#allocation2 + $0x98] sm:$0xf] %v449_v8 }
  0xdc   :  { %v443_v5 = vpop.permute.xlu1 %442 }
  0xdd   :  { %v448_v9 = vsel %vm446_vm6, %v441_v6, %v443_v5  ;;  %v447_v10 = vsel %vm446_vm6, %v443_v5, %v445_v0  ;;  %v481_v35 = vld [vmem:[#allocation2 + $0x28] sm:$0xff] }
  0xde   :  { %456 = vst [vmem:[#allocation2 + $0xc8] sm:$0xf] %v448_v9  ;;  %v485_v12 = vld [vmem:[#allocation2 + $0xd0] sm:$0xf]  ;;  %v198_v14 = vpop.permute.xlu2 %197 }
  0xdf   :  { %457 = vst [vmem:[#allocation2 + $0xe0] sm:$0xf] %v447_v10  ;;  %800 = vmatpush.msk.msra.mxu1 %vm500_vm7, %v485_v12  ;;  %v202_v15 = vsel %vm201_vm2, %v198_v14, %v1022_v13  ;;  %v203_v16 = vsel %vm201_vm2, %v1033_v19, %v198_v14  ;;  %v467_v13 = vld [vmem:[#allocation2 + $0x48] sm:$0xff]  ;;  %v480_v19 = vld [vmem:[#allocation2 + $0x38] sm:$0xff]  ;;  %v489_v46 = vld [vmem:[#allocation2 + $0x20] sm:$0xf] }
  0xe0   :  { %v218_v11 = vrot.slane %v203_v16, 4  ;;  %v219_v20 = vrot.slane %v202_v15, 4 }
  0xe1   :  { %551 = vmatpush.msra.mxu1 %v479_v18  ;;  %v46_v21 = vpop.permute.xlu0 %45 }
  0xe2   :  { %v62_v23 = vsel %vm57_vm8, %v967_v56, %v46_v21  ;;  %230 = vst [vmem:[#allocation2 + $0xe8] sm:$0xf0] %v218_v11  ;;  %v486_v24 = vld [vmem:[#allocation2 + $0x98] sm:$0xf] }
  0xe3   :  { %552 = vmatpush.msra.mxu1 %v473_v22  ;;  %65 = vst [vmem:[#allocation2] sm:$0xf] %v62_v23  ;;  %802 = vmatpush.msk.msra.mxu2 %vm500_vm7, %v486_v24 }
  0xe4   :  { %v92_v17 = vpop.permute.xlu1 %91  ;;  %231 = vst [vmem:[#allocation2 + $0xb8] sm:$0xf0] %v219_v20 }
  0xe5   :  { %553 = vmatpush.msra.mxu1 %v467_v13  ;;  %v102_v26 = vsel %vm99_vm0, %v92_v17, %v1067_v40  ;;  %v103_v28 = vsel %vm99_vm0, %v975_v57, %v92_v17  ;;  %v487_v29 = vld [vmem:[#allocation2 + $0xc8] sm:$0xf]  ;;  %571 = vmatpush.msra.mxu2 %v480_v19 }
  0xe6   :  { %v114_v31 = vrot.slane %v103_v28, 4  ;;  %v115_v32 = vrot.slane %v102_v26, 4  ;;  %804 = vmatpush.msk.msra.mxu3 %vm500_vm7, %v487_v29  ;;  %v52_v34 = vpop.permute.xlu2 %51  ;;  %v488_v15 = vld [vmem:[#allocation2 + $0xe0] sm:$0xf] }
  0xe7   :  { %572 = vmatpush.msra.mxu2 %v474_v33  ;;  %v59_v37 = vsel %vm57_vm8, %v1082_v51, %v52_v34  ;;  %v645_v33 = vld [vmem:[%s1225_s3] sm:$0xf] }
  0xe8   :  { %126 = vst [vmem:[#allocation2 + $0xd8] sm:$0xf0] %v114_v31  ;;  %591 = vmatpush.msra.mxu3 %v481_v35 }
  0xe9   :  { %127 = vst [vmem:[#allocation2 + $0x18] sm:$0xf0] %v115_v32  ;;  %v1122_v41 = vpop.permute.xlu0 %97 }
  0xea   :  { %592 = vmatpush.msra.mxu3 %v475_v39  ;;  %v105_v57 = vsel %vm99_vm0, %v1122_v41, %v992_v62  ;;  %v461_v42 = vld [vmem:[#allocation2] sm:$0xff]  ;;  %68 = vst [vmem:[#allocation2 + $0x50] sm:$0xf] %v59_v37 }
  0xeb   :  { %v112_v43 = vrot.slane %v105_v57, 4  ;;  %554 = vmatpush.msra.mxu1 %v461_v42 }
  0xec   :  { %v152_v47 = vpop.permute.xlu1 %151  ;;  %801 = vmatmul.msk.f32.vlgmr.msra.gmra.mxu1 %vm496_vm9, %v1132_v48 }
  0xed   :  { %808 = vmatpush.msk.msrb.mxu1 %vm500_vm7, %v489_v46  ;;  %124 = vst [vmem:[#allocation2 + $0xb0] sm:$0xf0] %v112_v43  ;;  %v162_v49 = vsel %vm159_vm1, %v152_v47, %v1075_v45  ;;  %v163_v62 = vsel %vm159_vm1, %v1002_v2, %v152_v47 }
  0xee   :  { %168 = vst [vmem:[#allocation2 + $0x80] sm:$0xf] %v163_v62 }
  0xef   :  { %169 = vst [vmem:[#allocation2 + $0x88] sm:$0xf] %v162_v49 }
  0xf1   :  { %v158_v50 = vpop.permute.xlu0 %157 }
  0xf2   :  { %v165_v52 = vsel %vm159_vm1, %v158_v50, %v1004_v3 }
  0xf3   :  { %166 = vst [vmem:[#allocation2 + $0x30] sm:$0xf] %v165_v52 }
  0xf4   :  { %v48_v55 = vpop.permute.xlu1 %47 }
  0xf5   :  { %v60_v2 = vsel %vm57_vm8, %v48_v55, %v1082_v51  ;;  %v61_v58 = vsel %vm57_vm8, %v46_v21, %v48_v55  ;;  %v468_v59 = vld [vmem:[#allocation2 + $0x80] sm:$0xff] }
  0xf6   :  { %66 = vst [vmem:[#allocation2 + $0xd8] sm:$0xf] %v61_v58  ;;  %573 = vmatpush.msra.mxu2 %v468_v59  ;;  %v469_v3 = vld [vmem:[#allocation2 + $0x88] sm:$0xff] }
  0xf7   :  { %67 = vst [vmem:[#allocation2 + $0x18] sm:$0xf] %v60_v2  ;;  %593 = vmatpush.msra.mxu3 %v469_v3 }
  0xf9   :  { %v54_v60 = vpop.permute.xlu0 %53 }
  0xfa   :  { %v58_v63 = vsel %vm57_vm8, %v52_v34, %v54_v60  ;;  %v63_v0 = vsel %vm57_vm8, %v54_v60, %v967_v56  ;;  %v466_v1 = vld [vmem:[#allocation2 + $0x30] sm:$0xff]  ;;  %v646_v34 = vld [vmem:[%s1226_s4] sm:$0xf] }
  0xfb   :  { %64 = vst [vmem:[#allocation2 + $0xb0] sm:$0xf] %v63_v0  ;;  %533 = vmatpush.msra.mxu0 %v466_v1  ;;  %649 = vperm.xlu1 %826, %v646_v34  }
  0xfc   :  { %69 = vst [vmem:[#allocation2 + $0x68] sm:$0xf] %v58_v63  ;;  %v385_v51 = vpop.permute.xlu1 %384 }
  0xfd   :  { %v387_v4 = vsel %vm386_vm5, %v1073_v44, %v385_v51  ;;  %v392_v7 = vsel %vm386_vm5, %v385_v51, %v1050_v30  ;;  %v462_v6 = vld [vmem:[#allocation2 + $0xd8] sm:$0xff] }
  0xfe   :  { %v403_v8 = vrot.slane %v387_v4, 4  ;;  %v404_v5 = vrot.slane %v392_v7, 4  ;;  %574 = vmatpush.msra.mxu2 %v462_v6  ;;  %v463_v9 = vld [vmem:[#allocation2 + $0x18] sm:$0xff] }
  0xff   :  { %594 = vmatpush.msra.mxu3 %v463_v9  ;;  %803 = vmatmul.msk.f32.vlgmr.msra.gmra.mxu2 %vm496_vm9, %v1132_v48 }
 0x100   :  { %415 = vst [vmem:[#allocation2 + $0x90] sm:$0xf0] %v403_v8  ;;  %805 = vmatmul.msk.f32.vlgmr.msra.gmra.mxu3 %vm496_vm9, %v1132_v48 }
 0x101   :  { %416 = vst [vmem:[#allocation2 + $0xa0] sm:$0xf0] %v404_v5  ;;  %v283_v56 = vpop.permute.xlu0 %282 }
 0x102   :  { %v285_v44 = vsel %vm284_vm3, %v1045_v27, %v283_v56  ;;  %v290_v30 = vsel %vm284_vm3, %v283_v56, %v1040_v25  ;;  %v460_v10 = vld [vmem:[#allocation2 + $0xb0] sm:$0xff] }
 0x103   :  { %v301_v12 = vrot.slane %v285_v44, 4  ;;  %v302_v14 = vrot.slane %v290_v30, 4  ;;  %534 = vmatpush.msra.mxu0 %v460_v10 }
 0x104   :  { %v343_v16 = vpop.permute.xlu1 %342  ;;  %799 = vmatmul.msk.f32.vlgmr.msra.gmra.mxu0 %vm496_vm9, %v1132_v48 }
 0x105   :  { %806 = vmatpush.msk.msrb.mxu0 %vm500_vm7, %v488_v15  ;;  %313 = vst [vmem:[#allocation2 + $0x8] sm:$0xf0] %v301_v12  ;;  %v345_v18 = vsel %vm344_vm4, %v1057_v36, %v343_v16  ;;  %v350_v27 = vsel %vm344_vm4, %v343_v16, %v1062_v38 }
 0x106   :  { %314 = vst [vmem:[#allocation2 + $0x78] sm:$0xf0] %v302_v14 }
 0x107   :  { %355 = vst [vmem:[#allocation2 + $0x90] sm:$0xf] %v345_v18 }
 0x108   :  { %356 = vst [vmem:[#allocation2 + $0xa0] sm:$0xf] %v350_v27 }
 0x109   :  { %v96_v25 = vpop.permute.xlu0 %95 }
 0x10a   :  { %v100_v11 = vsel %vm99_vm0, %v96_v25, %v1122_v41  ;;  %v101_v20 = vsel %vm99_vm0, %v1067_v40, %v96_v25 }
 0x10b   :  { %v116_v36 = vrot.slane %v101_v20, 4  ;;  %v117_v21 = vrot.slane %v100_v11, 4 }
 0x10c   :  { %v156_v22 = vpop.permute.xlu1 %155  ;;  %v476_v13 = vld [vmem:[#allocation2 + $0x8] sm:$0xff] }
 0x10d   :  { %128 = vst [vmem:[#allocation2 + $0x50] sm:$0xf0] %v116_v36  ;;  %v160_v38 = vsel %vm159_vm1, %v156_v22, %v158_v50  ;;  %v161_v23 = vsel %vm159_vm1, %v1075_v45, %v156_v22  ;;  %v477_v19 = vld [vmem:[#allocation2 + $0x78] sm:$0xff] }
 0x10e   :  { %129 = vst [vmem:[#allocation2 + $0x68] sm:$0xf0] %v117_v21  ;;  %v482_v24 = vld [vmem:[#allocation2 + $0x90] sm:$0xff] }
 0x10f   :  { %170 = vst [vmem:[#allocation2 + $0xe8] sm:$0xf] %v161_v23  ;;  %611 = vmatpush.msrb.mxu0 %v482_v24  ;;  %v483_v17 = vld [vmem:[#allocation2 + $0xa0] sm:$0xff] }
 0x110   :  { %171 = vst [vmem:[#allocation2 + $0xb8] sm:$0xf] %v160_v38  ;;  %631 = vmatpush.msrb.mxu1 %v483_v17 }
 0x111   :  { %612 = vmatpush.msrb.mxu0 %v476_v13 }
 0x112   :  { %632 = vmatpush.msrb.mxu1 %v477_v19 }
 0x114   :  { %v464_v26 = vld [vmem:[#allocation2 + $0x50] sm:$0xff] }
 0x115   :  { %v465_v29 = vld [vmem:[#allocation2 + $0x68] sm:$0xff] }
 0x116   :  { %v470_v40 = vld [vmem:[#allocation2 + $0xe8] sm:$0xff] }
 0x117   :  { %613 = vmatpush.msrb.mxu0 %v470_v40  ;;  %v471_v28 = vld [vmem:[#allocation2 + $0xb8] sm:$0xff] }
 0x118   :  { %633 = vmatpush.msrb.mxu1 %v471_v28 }
 0x119   :  { %614 = vmatpush.msrb.mxu0 %v464_v26 }
 0x11a   :  { %634 = vmatpush.msrb.mxu1 %v465_v29  ;;  %807 = vmatmul.msk.f32.vlgmr.msrb.gmra.mxu0 %vm496_vm9, %v1132_v48 }
 0x11b   :  { %809 = vmatmul.msk.f32.vlgmr.msrb.gmra.mxu1 %vm496_vm9, %v1132_v48 }
 0x147   :  { %v494_v61 = vpop.permute.xlu0 %493 }
 0x169   :  { %v556_v45 = vpop.f32.mrf.mxu1 }
 0x16a   :  { %v557_v31 = vadd.f32 %v556_v45, %v494_v61 }
 0x16c   :  { %v640_v32 = vmax.f32 %v557_v31, 0.0 }
 0x16d   :  { %v650_v55 = vpop.permute.xlu1 %649 }
 0x16e   :  { %691 = vmatpush.msrb.mxu3 %v640_v32 }
 0x16f   :  { %811 = vmatmul.msk.f32.vlgmr.msrb.gmra.mxu3 %vm652_vm10, %v645_v33 }
 0x181   :  { %v536_v35 = vpop.f32.mrf.mxu0 }
 0x182   :  { %v576_v37 = vpop.f32.mrf.mxu2  ;;  %v537_v39 = vadd.f32 %v536_v35, %v494_v61 }
 0x183   :  { %v577_v41 = vadd.f32 %v576_v37, %v494_v61  ;;  %v596_v57 = vpop.f32.mrf.mxu3 }
 0x184   :  { %v597_v42 = vadd.f32 %v596_v57, %v494_v61  ;;  %v639_v43 = vmax.f32 %v537_v39, 0.0 }
 0x185   :  { %v641_v46 = vmax.f32 %v577_v41, 0.0 }
 0x186   :  { %v642_v47 = vmax.f32 %v597_v42, 0.0  ;;  %671 = vmatpush.msrb.mxu2 %v639_v43 }
 0x187   :  { %810 = vmatmul.msk.f32.vlgmr.msrb.gmra.mxu2 %vm652_vm10, %v645_v33 }
 0x188   :  { %711 = vmatpush.msra.mxu2 %v641_v46  ;;  %731 = vmatpush.msra.mxu3 %v642_v47 }
 0x189   :  { %813 = vmatmul.msk.f32.vlgmr.msra.gmra.mxu3 %vm652_vm10, %v645_v33 }
 0x18f   :  { %812 = vmatmul.msk.f32.vlgmr.msra.gmra.mxu2 %vm652_vm10, %v645_v33 }
 0x197   :  { %v616_v48 = vpop.f32.mrf.mxu0 }
 0x198   :  { %v617_v49 = vadd.f32 %v616_v48, %v494_v61  ;;  %v636_v62 = vpop.f32.mrf.mxu1 }
 0x199   :  { %v637_v50 = vadd.f32 %v636_v62, %v494_v61 }
 0x19a   :  { %v643_v52 = vmax.f32 %v617_v49, 0.0 }
 0x19b   :  { %v644_v53 = vmax.f32 %v637_v50, 0.0 }
 0x19c   :  { %751 = vmatpush.msra.mxu0 %v643_v52 }
 0x19d   :  { %771 = vmatpush.msra.mxu1 %v644_v53  ;;  %814 = vmatmul.msk.f32.vlgmr.msra.gmra.mxu0 %vm652_vm10, %v645_v33 }
 0x19e   :  { %815 = vmatmul.msk.f32.vlgmr.msra.gmra.mxu1 %vm652_vm10, %v645_v33 }
 0x1f2   :  { %v693_v54 = vpop.f32.mrf.mxu3 }
 0x1f3   :  { %v694_v2 = vadd.f32 %v693_v54, %v650_v55 }
 0x1f5   :  { %v782_v58 = vrot.slane %v694_v2, 4 }
 0x20a   :  { %v673_v59 = vpop.f32.mrf.mxu2 }
 0x20b   :  { %v674_v60 = vadd.f32 %v673_v59, %v650_v55 }
 0x20c   :  { %v733_v3 = vpop.f32.mrf.mxu3 }
 0x20d   :  { %v785_v63 = vsel %vm500_vm7, %v674_v60, %v782_v58  ;;  %v734_v0 = vadd.f32 %v733_v3, %v650_v55 }
 0x20e   :  { %791 = vst [vmem:[%s1227_s5] sm:$0xff] %v785_v63 }
 0x20f   :  { %v783_v1 = vrot.slane %v734_v0, 4 }
 0x212   :  { %v713_v51 = vpop.f32.mrf.mxu2 }
 0x213   :  { %v714_v4 = vadd.f32 %v713_v51, %v650_v55 }
 0x215   :  { %v786_v7 = vsel %vm500_vm7, %v714_v4, %v783_v1 }
 0x216   :  { %792 = vst [vmem:[%s1227_s5 + $0x8] sm:$0xff] %v786_v7 }
 0x21a   :  { %v753_v8 = vpop.f32.mrf.mxu0 }
 0x21b   :  { %v773_v6 = vpop.f32.mrf.mxu1  ;;  %v754_v56 = vadd.f32 %v753_v8, %v650_v55 }
 0x21c   :  { %v774_v5 = vadd.f32 %v773_v6, %v650_v55 }
 0x21e   :  { %v784_v9 = vrot.slane %v774_v5, 4 }
 0x220   :  { %v787_v44 = vsel %vm500_vm7, %v754_v56, %v784_v9 }
 0x221   :  { %793 = vst [vmem:[%s1227_s5 + $0x10] sm:$0xff] %v787_v44 }

</bundles_post_ra>
